<compile_context>
chip_gen: v6e
topology: v6e:2x2x1
jax: 0.10.0
libtpu: 0.0.40
codegen_flags: <defaults>
</compile_context>

<pallas_src>
import functools

import jax
import jax.numpy as jnp
from jax import lax
from jax.experimental import pallas as pl
from jax.experimental.pallas import tpu as pltpu


def _conv_even_odd(xe, xo, w_ref, l_half):
    """Conv1d(C->2C, k=3, s=1) over the reflect-padded input, emitted directly in the
    even/odd output phases (length L/2 each); channels on sublanes, length on lanes.
    Inputs may be bf16; accumulation is f32."""
    w0 = w_ref[0]               # (2C, C)
    w1 = w_ref[1]
    w2 = w_ref[2]
    a0 = xe[:, :l_half]         # x_pad[2m]
    a1 = xo[:, :l_half]         # x_pad[2m+1]
    a2 = xe[:, 1:l_half + 1]    # x_pad[2m+2]
    a3 = xo[:, 1:l_half + 1]    # x_pad[2m+3]
    # TODO(synk): for small C the per-tap K=C contraction underfills the MXU; a fused
    # K=3C matmul (wrapper-packed [a0;a1;a2] slabs) would fill better but costs ~3x
    # input HBM bytes, a bad trade while the kernel is DMA-bound.
    y_even = (jnp.dot(w0, a0, preferred_element_type=jnp.float32)
              + jnp.dot(w1, a1, preferred_element_type=jnp.float32)
              + jnp.dot(w2, a2, preferred_element_type=jnp.float32))      # (2C, L/2)
    y_odd = (jnp.dot(w0, a1, preferred_element_type=jnp.float32)
             + jnp.dot(w1, a2, preferred_element_type=jnp.float32)
             + jnp.dot(w2, a3, preferred_element_type=jnp.float32))       # (2C, L/2)
    return y_even, y_odd


def _stats_kernel(xe_ref, xo_ref, w_ref, sum_ref, ssq_ref, *, l_half):
    """Per-batch partial BatchNorm statistics (per-channel sum, sum of squares)."""
    y_even, y_odd = _conv_even_odd(xe_ref[0], xo_ref[0], w_ref, l_half)
    sum_ref[0] = (jnp.sum(y_even, axis=1, keepdims=True)
                  + jnp.sum(y_odd, axis=1, keepdims=True))
    ssq_ref[0] = (jnp.sum(y_even * y_even, axis=1, keepdims=True)
                  + jnp.sum(y_odd * y_odd, axis=1, keepdims=True))


def _emit_kernel(xe_ref, xo_ref, w_ref, scale_ref, shift_ref, o_ref, *, l_half, neg_slope):
    """Recompute conv, apply BN affine (precomputed scale/shift), LeakyReLU and the
    analytic [1,2,1]/4 stride-2 AA downsample; store lane-dense (2C, L/2)."""
    y_even, y_odd = _conv_even_odd(xe_ref[0], xo_ref[0], w_ref, l_half)
    scale = scale_ref[...]                              # (2C, 1)
    shift = shift_ref[...]                              # (2C, 1)

    ze = y_even * scale + shift
    zo = y_odd * scale + shift
    ze = jnp.where(ze >= 0.0, ze, neg_slope * ze)       # LeakyReLU(0.2)
    zo = jnp.where(zo >= 0.0, zo, neg_slope * zo)

    # AADownsample: reflect pad + [1,2,1]/4, stride 2:
    #   out[m] = 0.25*y[2m-1] + 0.5*y[2m] + 0.25*y[2m+1]
    #          = 0.5*ze[m] + 0.25*(zo[m] + zo[m-1]),  with zo[-1] -> zo[0].
    if l_half % 128 == 0:
        # XLU rotation (co-issues with the VPU work) + lane-0 reflection fix.
        rolled = pltpu.roll(zo, 1, 1)
        lane = lax.broadcasted_iota(jnp.int32, zo.shape, 1)
        zo_prev = jnp.where(lane == 0, zo, rolled)
    else:
        # Short-sequence fallback (lane dim not 128-aligned).
        zo_prev = jnp.concatenate([zo[:, :1], zo[:, :l_half - 1]], axis=1)

    out = 0.5 * ze + 0.25 * (zo + zo_prev)              # (2C, L/2), lane-dense
    o_ref[0] = out.astype(o_ref.dtype)


def down_forward(x, w_conv, gamma, beta, *, d=2, k=3, use_bf16_matmul=True):
    """x: (N, C, L) NCL float.  Returns (N, 2C, L//2) NCL, matching PyTorch Down."""
    assert d == 2 and k == 3, "kernel is specialised to the module defaults d=2, k=3"
    x = jnp.asarray(x, jnp.float32)
    N, C, L = x.shape
    assert L % 2 == 0, "even input length required"
    # TODO(synk): odd L (and general d/k) would need an extra right-edge reflection term
    # in the even/odd decomposition; not needed for the module defaults exercised here.
    Co = 2 * C
    kk = d + 1
    L2 = L // 2   # AA-downsample output length for even L

    # Glue (pure layout, ~1x input bytes): reflect pad for the conv and even/odd
    # de-interleave so the kernel needs neither an im2col nor strided in-kernel loads.
    x_pad = jnp.pad(x, ((0, 0), (0, 0), (1, 1)), mode="reflect")       # (N, C, L+2)
    xe = x_pad[:, :, 0::2]                                             # (N, C, L2+1)
    xo = x_pad[:, :, 1::2]                                             # (N, C, L2+1)
    w3 = jnp.transpose(jnp.asarray(w_conv, jnp.float32), (2, 0, 1))    # (3, 2C, C)

    if use_bf16_matmul:   # MXU is bf16-native on v5e/v6e/v7x; BN/LeakyReLU stay f32
        xe = xe.astype(jnp.bfloat16)
        xo = xo.astype(jnp.bfloat16)
        w3 = w3.astype(jnp.bfloat16)

    item = xe.dtype.itemsize
    per_step_bytes = (2 * 2 * C * (L2 + 1) * item      # xe/xo blocks, double-buffered
                      + kk * Co * C * item             # resident conv weights
                      + 2 * Co * L2 * 4                # output block, double-buffered
                      + 8 * Co * 4)                    # scale/shift/partial-stat blocks
    vmem_limit = int(min(64 * 2 ** 20, max(32 * 2 ** 20, 4 * per_step_bytes)))
    # TODO(synk): no L-tiling path yet; for very large per-batch C*L2 working sets
    # (v7x has only 64 MiB VMEM) add an L-tile grid axis with a 1-element even/odd halo.
    # TODO(synk): for short sequences (L2 < 128) output stores are lane-masked; folding
    # batch into lanes needs a different output memory layout, not done here.
    cparams = pltpu.CompilerParams(dimension_semantics=("parallel",),
                                   vmem_limit_bytes=vmem_limit)

    conv_flops = 2 * N * Co * (kk * C) * L
    in_bytes = (xe.size + xo.size + w3.size) * item

    # Pass 1: per-batch partial BN statistics (batch axis "parallel" -> v7x megacore).
    stats_kernel = functools.partial(_stats_kernel, l_half=L2)
    sums, ssqs = pl.pallas_call(
        stats_kernel,
        out_shape=(jax.ShapeDtypeStruct((N, Co, 1), jnp.float32),
                   jax.ShapeDtypeStruct((N, Co, 1), jnp.float32)),
        grid=(N,),
        in_specs=[
            pl.BlockSpec((1, C, L2 + 1), lambda n: (n, 0, 0)),   # xe (even taps)
            pl.BlockSpec((1, C, L2 + 1), lambda n: (n, 0, 0)),   # xo (odd taps)
            pl.BlockSpec((kk, Co, C), lambda n: (0, 0, 0)),      # conv weight (resident)
        ],
        out_specs=(pl.BlockSpec((1, Co, 1), lambda n: (n, 0, 0)),
                   pl.BlockSpec((1, Co, 1), lambda n: (n, 0, 0))),
        compiler_params=cparams,
        cost_estimate=pl.CostEstimate(flops=conv_flops, transcendentals=0,
                                      bytes_accessed=in_bytes + 2 * N * Co * 4),
    )(xe, xo, w3)

    # Tiny combine in plain XLA: training-mode BatchNorm1d statistics (biased variance).
    cnt = float(N * L)
    mean = jnp.sum(sums, axis=0) / cnt                       # (2C, 1)
    var = jnp.sum(ssqs, axis=0) / cnt - mean * mean
    # TODO(synk): E[y^2]-E[y]^2 in f32 can cancel for huge N*L with large activation
    # means; a numerically safer two-pass mean/variance would need a third data sweep.
    scale = jnp.asarray(gamma, jnp.float32).reshape(Co, 1) * lax.rsqrt(var + 1e-5)
    shift = jnp.asarray(beta, jnp.float32).reshape(Co, 1) - mean * scale

    # Pass 2: recompute conv, normalize, LeakyReLU, AA-downsample, store once per block.
    emit_kernel = functools.partial(_emit_kernel, l_half=L2, neg_slope=0.2)
    out = pl.pallas_call(
        emit_kernel,
        out_shape=jax.ShapeDtypeStruct((N, Co, L2), jnp.float32),
        grid=(N,),
        in_specs=[
            pl.BlockSpec((1, C, L2 + 1), lambda n: (n, 0, 0)),   # xe
            pl.BlockSpec((1, C, L2 + 1), lambda n: (n, 0, 0)),   # xo
            pl.BlockSpec((kk, Co, C), lambda n: (0, 0, 0)),      # conv weight (resident)
            pl.BlockSpec((Co, 1), lambda n: (0, 0)),             # BN scale (resident)
            pl.BlockSpec((Co, 1), lambda n: (0, 0)),             # BN shift (resident)
        ],
        out_specs=pl.BlockSpec((1, Co, L2), lambda n: (n, 0, 0)),  # lane-dense output
        compiler_params=cparams,
        cost_estimate=pl.CostEstimate(flops=conv_flops, transcendentals=0,
                                      bytes_accessed=in_bytes + N * Co * L2 * 4),
    )(xe, xo, w3, scale, shift)
    return out


def _down_reference(x, w_conv, gamma, beta, *, bf16_conv=False):
    """Pure-JAX reference of the PyTorch Down forward (training-mode BN)."""
    x = jnp.asarray(x, jnp.float32)
    N, C, L = x.shape
    Co = 2 * C
    x_pad = jnp.pad(x, ((0, 0), (0, 0), (1, 1)), mode="reflect")
    w = jnp.asarray(w_conv, jnp.float32)
    if bf16_conv:   # mirror the kernel's bf16 MXU inputs (f32 accumulation)
        x_pad = x_pad.astype(jnp.bfloat16).astype(jnp.float32)
        w = w.astype(jnp.bfloat16).astype(jnp.float32)
    y = jnp.zeros((N, Co, L), jnp.float32)
    for t in range(3):
        y = y + jnp.einsum("oc,ncl->nol", w[:, :, t], x_pad[:, :, t:t + L])
    mean = jnp.mean(y, axis=(0, 2), keepdims=True)
    var = jnp.mean((y - mean) ** 2, axis=(0, 2), keepdims=True)
    y = (y - mean) * lax.rsqrt(var + 1e-5) * gamma.reshape(1, Co, 1) + beta.reshape(1, Co, 1)
    y = jnp.where(y >= 0.0, y, 0.2 * y)
    y_pad = jnp.pad(y, ((0, 0), (0, 0), (1, 1)), mode="reflect")
    L_out = (L + 2 - 3) // 2 + 1
    filt = (0.25, 0.5, 0.25)
    return sum(filt[t] * y_pad[:, :, t:t + 2 * (L_out - 1) + 1:2] for t in range(3))


if __name__ == "__main__":
    key = jax.random.PRNGKey(0)
    k1, k2, k3, k4 = jax.random.split(key, 4)

    N, C, L = 2, 4, 16
    d, k = 2, 3
    Co = 2 * C

    x = jax.random.normal(k1, (N, C, L), dtype=jnp.float32)
    w_conv = 0.1 * jax.random.normal(k2, (Co, C, d + 1), dtype=jnp.float32)  # Conv1d weight, no bias
    gamma = 1.0 + 0.1 * jax.random.normal(k3, (Co,), dtype=jnp.float32)      # BN weight
    beta = 0.1 * jax.random.normal(k4, (Co,), dtype=jnp.float32)             # BN bias

    # Default path: bf16 MXU inputs, f32 statistics / epilogue.
    y = down_forward(x, w_conv, gamma, beta, d=d, k=k)
    jax.block_until_ready(y)

    L_out = L // 2
    assert y.shape == (N, Co, L_out), y.shape
    assert y.dtype == jnp.float32
    y_ref_bf16 = _down_reference(x, w_conv, gamma, beta, bf16_conv=True)
    assert bool(jnp.allclose(y, y_ref_bf16, rtol=1e-3, atol=1e-3)), \
        "bf16 path mismatch vs pure-JAX reference"

    # Full-precision path.
    y32 = down_forward(x, w_conv, gamma, beta, d=d, k=k, use_bf16_matmul=False)
    jax.block_until_ready(y32)
    y_ref = _down_reference(x, w_conv, gamma, beta, bf16_conv=False)
    assert bool(jnp.allclose(y32, y_ref, rtol=1e-3, atol=1e-3)), \
        "f32 path mismatch vs pure-JAX reference"

    print("KERNEL_OK")
</pallas_src>

<mosaic_0001>
module attributes {stable_mosaic.version = 11 : i64} {
  func.func @_stats_kernel(%arg0: i32, %arg1: memref<1x4x9xbf16, #tpu.memory_space<vmem>>, %arg2: memref<1x4x9xbf16, #tpu.memory_space<vmem>>, %arg3: memref<3x8x4xbf16, #tpu.memory_space<vmem>>, %arg4: memref<1x8x1xf32, #tpu.memory_space<vmem>>, %arg5: memref<1x8x1xf32, #tpu.memory_space<vmem>>) attributes {dimension_semantics = [#tpu.dimension_semantics<parallel>], iteration_bounds = array<i64: 2>, scalar_prefetch = 0 : i64, scratch_operands = 0 : i64, tpu.core_type = #tpu.core_type<tc>, window_params = [{transform_indices = @transform_0, window_bounds = array<i64: 1, 4, 9>}, {transform_indices = @transform_1, window_bounds = array<i64: 1, 4, 9>}, {pipeline_mode = #tpu.pipeline_mode<synchronous>, transform_indices = @transform_2, window_bounds = array<i64: 3, 8, 4>}, {transform_indices = @transform_3, window_bounds = array<i64: 1, 8, 1>}, {transform_indices = @transform_4, window_bounds = array<i64: 1, 8, 1>}]} {
    %c0 = arith.constant 0 : index
    %c0_0 = arith.constant 0 : index
    %c0_1 = arith.constant 0 : index
    %0 = vector.load %arg1[%c0, %c0_0, %c0_1] : memref<1x4x9xbf16, #tpu.memory_space<vmem>>, vector<1x4x9xbf16>
    %1 = vector.shape_cast %0 : vector<1x4x9xbf16> to vector<4x9xbf16>
    %c0_2 = arith.constant 0 : index
    %c0_3 = arith.constant 0 : index
    %c0_4 = arith.constant 0 : index
    %2 = vector.load %arg2[%c0_2, %c0_3, %c0_4] : memref<1x4x9xbf16, #tpu.memory_space<vmem>>, vector<1x4x9xbf16>
    %3 = vector.shape_cast %2 : vector<1x4x9xbf16> to vector<4x9xbf16>
    %c0_5 = arith.constant 0 : index
    %c0_6 = arith.constant 0 : index
    %c0_7 = arith.constant 0 : index
    %4 = vector.load %arg3[%c0_5, %c0_6, %c0_7] : memref<3x8x4xbf16, #tpu.memory_space<vmem>>, vector<1x8x4xbf16>
    %5 = vector.shape_cast %4 : vector<1x8x4xbf16> to vector<8x4xbf16>
    %c1 = arith.constant 1 : index
    %c0_8 = arith.constant 0 : index
    %c0_9 = arith.constant 0 : index
    %6 = vector.load %arg3[%c1, %c0_8, %c0_9] : memref<3x8x4xbf16, #tpu.memory_space<vmem>>, vector<1x8x4xbf16>
    %7 = vector.shape_cast %6 : vector<1x8x4xbf16> to vector<8x4xbf16>
    %c2 = arith.constant 2 : index
    %c0_10 = arith.constant 0 : index
    %c0_11 = arith.constant 0 : index
    %8 = vector.load %arg3[%c2, %c0_10, %c0_11] : memref<3x8x4xbf16, #tpu.memory_space<vmem>>, vector<1x8x4xbf16>
    %9 = vector.shape_cast %8 : vector<1x8x4xbf16> to vector<8x4xbf16>
    %10 = vector.extract_strided_slice %1 {offsets = [0, 0], sizes = [4, 8], strides = [1, 1]} : vector<4x9xbf16> to vector<4x8xbf16>
    %11 = vector.extract_strided_slice %3 {offsets = [0, 0], sizes = [4, 8], strides = [1, 1]} : vector<4x9xbf16> to vector<4x8xbf16>
    %12 = vector.extract_strided_slice %1 {offsets = [0, 1], sizes = [4, 8], strides = [1, 1]} : vector<4x9xbf16> to vector<4x8xbf16>
    %13 = vector.extract_strided_slice %3 {offsets = [0, 1], sizes = [4, 8], strides = [1, 1]} : vector<4x9xbf16> to vector<4x8xbf16>
    %cst = arith.constant dense<0.000000e+00> : vector<8x8xf32>
    %14 = tpu.matmul %5, %10, %cst {dimension_numbers = #tpu.dot_dimension_numbers<[1], [0], [0], [1], [0, 0, 1, 1], [], []>} : vector<8x4xbf16>, vector<4x8xbf16>, vector<8x8xf32> -> vector<8x8xf32>
    %cst_12 = arith.constant dense<0.000000e+00> : vector<8x8xf32>
    %15 = tpu.matmul %7, %11, %cst_12 {dimension_numbers = #tpu.dot_dimension_numbers<[1], [0], [0], [1], [0, 0, 1, 1], [], []>} : vector<8x4xbf16>, vector<4x8xbf16>, vector<8x8xf32> -> vector<8x8xf32>
    %16 = arith.addf %14, %15 : vector<8x8xf32>
    %cst_13 = arith.constant dense<0.000000e+00> : vector<8x8xf32>
    %17 = tpu.matmul %9, %12, %cst_13 {dimension_numbers = #tpu.dot_dimension_numbers<[1], [0], [0], [1], [0, 0, 1, 1], [], []>} : vector<8x4xbf16>, vector<4x8xbf16>, vector<8x8xf32> -> vector<8x8xf32>
    %18 = arith.addf %16, %17 : vector<8x8xf32>
    %cst_14 = arith.constant dense<0.000000e+00> : vector<8x8xf32>
    %19 = tpu.matmul %5, %11, %cst_14 {dimension_numbers = #tpu.dot_dimension_numbers<[1], [0], [0], [1], [0, 0, 1, 1], [], []>} : vector<8x4xbf16>, vector<4x8xbf16>, vector<8x8xf32> -> vector<8x8xf32>
    %cst_15 = arith.constant dense<0.000000e+00> : vector<8x8xf32>
    %20 = tpu.matmul %7, %12, %cst_15 {dimension_numbers = #tpu.dot_dimension_numbers<[1], [0], [0], [1], [0, 0, 1, 1], [], []>} : vector<8x4xbf16>, vector<4x8xbf16>, vector<8x8xf32> -> vector<8x8xf32>
    %21 = arith.addf %19, %20 : vector<8x8xf32>
    %cst_16 = arith.constant dense<0.000000e+00> : vector<8x8xf32>
    %22 = tpu.matmul %9, %13, %cst_16 {dimension_numbers = #tpu.dot_dimension_numbers<[1], [0], [0], [1], [0, 0, 1, 1], [], []>} : vector<8x4xbf16>, vector<4x8xbf16>, vector<8x8xf32> -> vector<8x8xf32>
    %23 = arith.addf %21, %22 : vector<8x8xf32>
    %cst_17 = arith.constant dense<0.000000e+00> : vector<8xf32>
    %24 = vector.multi_reduction <add>, %18, %cst_17 [1] : vector<8x8xf32> to vector<8xf32>
    %25 = vector.shape_cast %24 : vector<8xf32> to vector<8x1xf32>
    %cst_18 = arith.constant dense<0.000000e+00> : vector<8xf32>
    %26 = vector.multi_reduction <add>, %23, %cst_18 [1] : vector<8x8xf32> to vector<8xf32>
    %27 = vector.shape_cast %26 : vector<8xf32> to vector<8x1xf32>
    %28 = arith.addf %25, %27 : vector<8x1xf32>
    %c0_19 = arith.constant 0 : index
    %c0_20 = arith.constant 0 : index
    %c0_21 = arith.constant 0 : index
    %29 = vector.load %arg4[%c0_19, %c0_20, %c0_21] : memref<1x8x1xf32, #tpu.memory_space<vmem>>, vector<1x8x1xf32>
    %30 = vector.shape_cast %29 : vector<1x8x1xf32> to vector<8x1xf32>
    %31 = vector.shape_cast %28 : vector<8x1xf32> to vector<1x8x1xf32>
    tpu.vector_store %arg4[%c0_19, %c0_20, %c0_21], %31 {strides = array<i32>} : memref<1x8x1xf32, #tpu.memory_space<vmem>>, vector<1x8x1xf32>,
    %32 = arith.mulf %18, %18 : vector<8x8xf32>
    %cst_22 = arith.constant dense<0.000000e+00> : vector<8xf32>
    %33 = vector.multi_reduction <add>, %32, %cst_22 [1] : vector<8x8xf32> to vector<8xf32>
    %34 = vector.shape_cast %33 : vector<8xf32> to vector<8x1xf32>
    %35 = arith.mulf %23, %23 : vector<8x8xf32>
    %cst_23 = arith.constant dense<0.000000e+00> : vector<8xf32>
    %36 = vector.multi_reduction <add>, %35, %cst_23 [1] : vector<8x8xf32> to vector<8xf32>
    %37 = vector.shape_cast %36 : vector<8xf32> to vector<8x1xf32>
    %38 = arith.addf %34, %37 : vector<8x1xf32>
    %c0_24 = arith.constant 0 : index
    %c0_25 = arith.constant 0 : index
    %c0_26 = arith.constant 0 : index
    %39 = vector.load %arg5[%c0_24, %c0_25, %c0_26] : memref<1x8x1xf32, #tpu.memory_space<vmem>>, vector<1x8x1xf32>
    %40 = vector.shape_cast %39 : vector<1x8x1xf32> to vector<8x1xf32>
    %41 = vector.shape_cast %38 : vector<8x1xf32> to vector<1x8x1xf32>
    tpu.vector_store %arg5[%c0_24, %c0_25, %c0_26], %41 {strides = array<i32>} : memref<1x8x1xf32, #tpu.memory_space<vmem>>, vector<1x8x1xf32>,
    return
  }
  func.func @transform_0(%arg0: i32) -> (i32, i32, i32) {
    %c0_i32 = arith.constant 0 : i32
    %c0_i32_0 = arith.constant 0 : i32
    %c0_i32_1 = arith.constant 0 : i32
    return %arg0, %c0_i32, %c0_i32_0 : i32, i32, i32
  }
  func.func @transform_1(%arg0: i32) -> (i32, i32, i32) {
    %c0_i32 = arith.constant 0 : i32
    %c0_i32_0 = arith.constant 0 : i32
    %c0_i32_1 = arith.constant 0 : i32
    return %arg0, %c0_i32, %c0_i32_0 : i32, i32, i32
  }
  func.func @transform_2(%arg0: i32) -> (i32, i32, i32) {
    %c0_i32 = arith.constant 0 : i32
    %c0_i32_0 = arith.constant 0 : i32
    %c0_i32_1 = arith.constant 0 : i32
    %c0_i32_2 = arith.constant 0 : i32
    return %c0_i32, %c0_i32_0, %c0_i32_1 : i32, i32, i32
  }
  func.func @transform_3(%arg0: i32) -> (i32, i32, i32) {
    %c0_i32 = arith.constant 0 : i32
    %c0_i32_0 = arith.constant 0 : i32
    %c0_i32_1 = arith.constant 0 : i32
    return %arg0, %c0_i32, %c0_i32_0 : i32, i32, i32
  }
  func.func @transform_4(%arg0: i32) -> (i32, i32, i32) {
    %c0_i32 = arith.constant 0 : i32
    %c0_i32_0 = arith.constant 0 : i32
    %c0_i32_1 = arith.constant 0 : i32
    return %arg0, %c0_i32, %c0_i32_0 : i32, i32, i32
  }
}

</mosaic_0001>

<bundles_post_ra>
// kernel: tpu_custom_call.1
= control target key start
LH: loop header
LB: loop body
LE: loop exit
PB: predicated region body
PF: predicated region fallthrough
CT: control target
= control target key end

     0   :  { %s746_s15 = smov 0   ;;  %s802_s0 = inlined_call_operand.vmem [shape: bf16[2,4,9], index: 0, kind: input, shape index: {}]   ;;  %s803_s1 = inlined_call_operand.vmem [shape: bf16[2,4,9], index: 1, kind: input, shape index: {}]   ;;  %s804_s2 = inlined_call_operand.vmem [shape: bf16[3,8,4], index: 2, kind: input, shape index: {}]   ;;  %s805_s3 = inlined_call_operand.vmem [shape: f32[2,8,1], index: 3, kind: output, shape index: {0}]   ;;  %s806_s4 = inlined_call_operand.vmem [shape: f32[2,8,1], index: 4, kind: output, shape index: {1}]  }
   0x1 LB: > { %s630_s16 = sadd.s32 4294967295, %s715_s15   ;;  %p634_p0 = scmp.ge.s32.totalorder %s715_s15, 1  ;;  %s715_s15 = sphi %s746_s15, %s15_s15  }
   0x2   : > { %p173_p1 = scmp.lt.s32.totalorder %s715_s15, 3 }
   0x4   : > { %p174_p2 = pnand %p634_p0, %p173_p1 }
   0x5   : > { %p205_p3 = scmp.lt.s32.totalorder (!%p174_p2), %s630_s16, 1  ;;  %s720_s28 = smov (!%p174_p2), 127  }
   0x6   : > { %177 = sbr.rel (%p174_p2) target bundleno = 490 (0x1ea), region = 32 }
   0xb   : > { %v327_v0 = vlaneseq  ;;  %v717_v1 = vmov 1983009808   ;;  %v718_v3 = vmov 0.0   ;;  %s808_s16 = smov (!%p205_p3, %s630_s16), 1  ;;  %vm719_vm0 = vmmov 0  }
   0xc   : > { %v325_v2 = vunpack.c.l.s4 %v717_v1  ;;  %661 = vmatprep.subr.bf16.mxu0 %v718_v3  ;;  %667 = vmatprep.subr.bf16.mxu1 %v718_v3  ;;  %s635_s17 = sshll.u32 %s808_s16, 1  ;;  %vm233_vm1 = vcmask 1041408   ;;  %v639_v12 = vld [vmem:[%s804_s2 + $0x4] sm:$0xf]  ;;  %vm229_vm2 = vcmask 31744   ;;  %vm514_vm3 = vcmask 64512  }
   0xd   : > { %v328_v4 = vshrl.u32 %v327_v0, 7  ;;  %663 = vmatprep.mubr.msk.bf16.mxu0 %vm719_vm0, %v718_v3  ;;  %669 = vmatprep.mubr.msk.bf16.mxu1 %vm719_vm0, %v718_v3  ;;  %s208_s20 = scalar_lea.vmem %s802_s0, %s635_s17  ;;  %s212_s23 = scalar_lea.vmem %s803_s1, %s635_s17  ;;  %v224_v13 = vld [vmem:[%s804_s2] sm:$0xf]  ;;  %v640_v17 = vld [vmem:[%s804_s2 + $0x8] sm:$0xf]  ;;  %vm522_vm4 = vcmask 7168  }
   0xe   : > { %v326_v5 = vunpack.c.0.s8 %v325_v2  ;;  %v222_v7 = vld [vmem:[%s208_s20] sm:$0x3]  ;;  %s637_s5 = sshll.u32 %s808_s16, 3 }
   0xf   : > { %v223_v8 = vld [vmem:[%s212_s23] sm:$0x3]  ;;  %v281_v11 = vsel %vm233_vm1, %v222_v7, 0  ;;  %s216_s8 = scalar_lea.vmem %s805_s3, %s637_s5  ;;  %s220_s11 = scalar_lea.vmem %s806_s4, %s637_s5 }
  0x10   : > { %v329_v6 = vsub.s32 %v326_v5, %v328_v4  ;;  %v235_v10 = vsel %vm233_vm1, %v223_v8, 0  ;;  %668 = vmatpush3.bf16.msra.mxu1 %v281_v11 }
  0x11   : > { %662 = vmatpush3.bf16.msra.mxu0 %v235_v10  ;;  %679 = vmatprep.subr.bf16.mxu1 %v718_v3 }
  0x12   : > { %v330_v9 = vrot.slane %v222_v7, %v329_v6  ;;  %v467_v14 = vrot.slane %v223_v8, %v329_v6  ;;  %673 = vmatprep.subr.bf16.mxu0 %v718_v3 }
  0x13   : > { %670 = vmatmul.mubr.msk.bf16.vlgmr.msra.gmra.mxu1 %vm229_vm2, %v224_v13 }
  0x14   : > { %331 = vrot.lane.b32.xlu0 %v330_v9, %s720_s28  ;;  %664 = vmatmul.mubr.msk.bf16.vlgmr.msra.gmra.mxu0 %vm229_vm2, %v639_v12 }
  0x15   : > { %675 = vmatprep.mubr.msk.bf16.mxu0 %vm719_vm0, %v718_v3  ;;  %681 = vmatprep.mubr.msk.bf16.mxu1 %vm719_vm0, %v718_v3 }
  0x18   : > { %468 = vrot.lane.b32.xlu0 %v467_v14, %s720_s28 }
  0x86   : > { %v332_v15 = vpop.permute.xlu0 %331 }
  0x87   : > { %v337_v16 = vsel %vm233_vm1, %v332_v15, 0 }
  0x88   : > { %674 = vmatpush3.bf16.msra.mxu0 %v337_v16  ;;  %680 = vmatpush3.bf16.msra.mxu1 %v337_v16 }
  0x89   : > { %685 = vmatprep.subr.bf16.mxu0 %v718_v3  ;;  %691 = vmatprep.subr.bf16.mxu1 %v718_v3 }
  0x8a   : > { %v469_v18 = vpop.permute.xlu0 %468 }
  0x8b   : > { %676 = vmatmul.mubr.msk.bf16.vlgmr.msra.gmra.mxu0 %vm229_vm2, %v640_v17  ;;  %682 = vmatmul.mubr.msk.bf16.vlgmr.msra.gmra.mxu1 %vm229_vm2, %v639_v12  ;;  %v471_v19 = vsel %vm233_vm1, %v469_v18, 0 }
  0x8c   : > { %686 = vmatpush3.bf16.msra.mxu0 %v235_v10  ;;  %692 = vmatpush3.bf16.msra.mxu1 %v471_v19 }
  0x8d   : > { %687 = vmatprep.mubr.msk.bf16.mxu0 %vm719_vm0, %v718_v3  ;;  %693 = vmatprep.mubr.msk.bf16.mxu1 %vm719_vm0, %v718_v3 }
  0x93   : > { %688 = vmatmul.mubr.msk.bf16.vlgmr.msra.gmra.mxu0 %vm229_vm2, %v224_v13  ;;  %694 = vmatmul.mubr.msk.bf16.vlgmr.msra.gmra.mxu1 %vm229_vm2, %v640_v17 }
  0xd3   : > { %v317_v21 = vpop.f32.mrf.mxu1 }
  0xd4   : > { %v271_v20 = vpop.f32.mrf.mxu0 }
  0xd5   : > { %v318_v22 = vadd.f32 %v317_v21, %v271_v20  ;;  %v671_v24 = vpop.f32.mrf.mxu1 }
  0xd6   : > { %v665_v23 = vpop.f32.mrf.mxu0 }
  0xd7   : > { %v320_v26 = vpop.f32.mrf.mxu1 }
  0xd8   : > { %v274_v25 = vpop.f32.mrf.mxu0 }
  0xd9   : > { %v672_v28 = vpop.f32.mrf.mxu1 }
  0xda   : > { %v666_v27 = vpop.f32.mrf.mxu0 }
 0x14b   : > { %v373_v29 = vpop.f32.mrf.mxu0  ;;  %v414_v30 = vpop.f32.mrf.mxu1 }
 0x14c   : > { %v379_v31 = vadd.f32 %v373_v29, %v318_v22 }
 0x14d   : > { %v677_v32 = vpop.f32.mrf.mxu0  ;;  %v683_v33 = vpop.f32.mrf.mxu1 }
 0x14e   : > { %v515_v34 = vsel %vm514_vm3, %v379_v31, 0.0  ;;  %v524_v35 = vmul.f32 %v379_v31, %v379_v31 }
 0x14f   : > { %v376_v36 = vpop.f32.mrf.mxu0  ;;  %516 = vadd.xlane.f32.xlu1 %v515_v34  ;;  %v417_v37 = vpop.f32.mrf.mxu1 }
 0x150   : > { %v525_v38 = vsel %vm514_vm3, %v524_v35, 0.0 }
 0x151   : > { %v678_v39 = vpop.f32.mrf.mxu0  ;;  %526 = vadd.xlane.f32.xlu0 %v525_v38  ;;  %v684_v40 = vpop.f32.mrf.mxu1 }
 0x153   : > { %v454_v41 = vpop.f32.mrf.mxu0  ;;  %v507_v42 = vpop.f32.mrf.mxu1 }
 0x154   : > { %v455_v43 = vadd.f32 %v454_v41, %v414_v30 }
 0x155   : > { %v689_v44 = vpop.f32.mrf.mxu0  ;;  %v695_v45 = vpop.f32.mrf.mxu1 }
 0x156   : > { %v513_v46 = vadd.f32 %v507_v42, %v455_v43 }
 0x157   : > { %v457_v47 = vpop.f32.mrf.mxu0  ;;  %v510_v48 = vpop.f32.mrf.mxu1 }
 0x158   : > { %v518_v49 = vsel %vm514_vm3, %v513_v46, 0.0  ;;  %v528_v50 = vmul.f32 %v513_v46, %v513_v46 }
 0x159   : > { %v690_v51 = vpop.f32.mrf.mxu0  ;;  %519 = vadd.xlane.f32.xlu1 %v518_v49  ;;  %v696_v52 = vpop.f32.mrf.mxu1 }
 0x15a   : > { %v529_v53 = vsel %vm514_vm3, %v528_v50, 0.0 }
 0x15d   : > { %530 = vadd.xlane.f32.xlu1 %v529_v53 }
 0x1d8   : > { %v517_v54 = vpop.xlane.xlu1 %516 }
 0x1da   : > { %v527_v57 = vpop.xlane.xlu0 %526 }
 0x1e2   : > { %v520_v55 = vpop.xlane.xlu1 %519 }
 0x1e3   : > { %v521_v56 = vadd.f32 %v520_v55, %v517_v54 }
 0x1e5   : > { %523 = vst.msk [vmem:[%s216_s8] sm:$0xff] %vm522_vm4, %v521_v56 }
 0x1e6   : > { %v531_v58 = vpop.xlane.xlu1 %530 }
 0x1e7   : > { %v532_v59 = vadd.f32 %v531_v58, %v527_v57 }
 0x1e9   : > { %533 = vst.msk [vmem:[%s220_s11] sm:$0xff] %vm522_vm4, %v532_v59 }
 0x1ea PF: > { %s15_s15 = sadd.s32 1, %s715_s15  }
 0x1eb   : > { %p12_p4 = scmp.ge.s32.totalorder %s15_s15, 4  }
 0x1ed   :  { %14 = sbr.rel (!%p12_p4) target bundleno = 1 (0x1), region = 79 }

</bundles_post_ra>
